<compile_context>
chip_gen: v6e
topology: v6e:2x2x1
jax: 0.10.0
libtpu: 0.0.40
codegen_flags: <defaults>
</compile_context>

<pallas_src>
import jax
import jax.numpy as jnp
from jax import lax
from jax.experimental import pallas as pl
from jax.experimental.pallas import tpu as pltpu


_CHUNK = 256  # inner column-chunk width (lanes); multiple of 128


def mlp_kernel(x_ref, w1_ref, b1_ref, w2_ref, b2_ref, w3_ref, b3_ref, o_ref):
    # x_ref: (block_b, D) batch-major input tile (no wrapper transpose).
    # o_ref: (1, block_b) lane-dense output row.  Weights resident every step.
    block_b = o_ref.shape[1]
    num_chunks = block_b // _CHUNK

    w1 = w1_ref[...]                                        # (H1, D)
    w2 = w2_ref[...]                                        # (H2, H1)
    H1 = w1.shape[0]
    H2 = w2.shape[0]
    # Hoist broadcasts out of the chunk loop (JAX does not CSE broadcast_in_dim).
    b1 = jnp.broadcast_to(b1_ref[...], (H1, _CHUNK))
    b2 = jnp.broadcast_to(b2_ref[...], (H2, _CHUNK))
    w3 = jnp.broadcast_to(w3_ref[...], (H2, _CHUNK))
    b3 = b3_ref[0, 0]                                       # SMEM scalar

    def body(c, carry):
        start = pl.multiple_of(c * _CHUNK, _CHUNK)
        xc = x_ref[pl.ds(start, _CHUNK), :]                 # (CHUNK, D)

        # Layer 1: contract on D -> (H1, CHUNK); batch lands on lanes.
        h1 = lax.dot_general(w1, xc, (((1,), (1,)), ((), ())),
                             preferred_element_type=jnp.float32) + b1
        h1 = jnp.maximum(h1, 0.0)
        # TODO(synk): nn.Dropout(0.3) is identity at inference; training-mode
        # dropout (pltpu.prng_random_bits mask) intentionally not applied.

        # Layer 2: (H2, H1) @ (H1, CHUNK) -> (H2, CHUNK).
        h2 = jnp.dot(w2, h1, preferred_element_type=jnp.float32) + b2
        h2 = jnp.maximum(h2, 0.0)

        # Layer 3 (H2 -> 1): VPU multiply + sublane (XLU) reduce.
        out = jnp.sum(h2 * w3, axis=0, keepdims=True) + b3  # (1, CHUNK)
        o_ref[:, pl.ds(start, _CHUNK)] = out.astype(o_ref.dtype)
        return carry

    lax.fori_loop(0, num_chunks, body, 0, unroll=True)


def income_regressor_forward(x, params, *, block_b=2048, use_bf16=False):
    """x: (B, input_dim) float32 -> (B, 1) float32."""
    w1, b1, w2, b2, w3, b3 = params
    B, D = x.shape
    H1 = w1.shape[0]   # 64
    H2 = w2.shape[0]   # 32

    # (8,128)-tiling guard: batch tiles must be 128-aligned and chunk-divisible
    # for the in-kernel column loop.  D / H1 / H2 are full-array block dims.
    assert block_b % 128 == 0, "block_b must be a multiple of 128"
    assert block_b % _CHUNK == 0, f"block_b must be a multiple of {_CHUNK}"

    if use_bf16:
        # v6e/v7x: halve the HBM read of x (the roofline term); keep f32
        # accumulation and a f32 bias/ReLU epilogue.
        x = x.astype(jnp.bfloat16)
        w1 = w1.astype(jnp.bfloat16)

    # Clamp the tile for small batches so we don't pad tiny inputs up to the
    # default tile; large batches keep the big tile (and >=2 grid blocks).
    block_b = min(block_b, pl.cdiv(B, _CHUNK) * _CHUNK)

    num_blocks = pl.cdiv(B, block_b)
    B_pad = num_blocks * block_b
    if B_pad != B:
        # Only when B is not already a tile multiple.  Padded batch columns
        # produce garbage outputs that are sliced off below.
        x = jnp.pad(x, ((0, B_pad - B), (0, 0)))

    flops = 2 * B_pad * (D * H1 + H1 * H2 + H2)
    param_bytes = sum(int(p.size) * p.dtype.itemsize
                      for p in (w1, b1, w2, b2, w3, b3))
    bytes_accessed = B_pad * D * x.dtype.itemsize + B_pad * 4 + param_bytes

    out = pl.pallas_call(
        mlp_kernel,
        out_shape=jax.ShapeDtypeStruct((1, B_pad), jnp.float32),
        grid_spec=pltpu.PrefetchScalarGridSpec(
            num_scalar_prefetch=0,
            grid=(num_blocks,),
            in_specs=[
                # batch tile of x, batch-major (sublanes), full D on lanes
                pl.BlockSpec((block_b, D), lambda i: (i, 0)),
                # small resident weights / biases: same block every step
                pl.BlockSpec((H1, D), lambda i: (0, 0)),
                pl.BlockSpec((H1, 1), lambda i: (0, 0)),
                pl.BlockSpec((H2, H1), lambda i: (0, 0)),
                pl.BlockSpec((H2, 1), lambda i: (0, 0)),
                pl.BlockSpec((H2, 1), lambda i: (0, 0)),
                # final bias as an SMEM scalar (avoids a padded (8,128) tile)
                pl.BlockSpec(memory_space=pltpu.MemorySpace.SMEM),
            ],
            out_specs=pl.BlockSpec((1, block_b), lambda i: (0, i)),
        ),
        compiler_params=pltpu.CompilerParams(
            dimension_semantics=("parallel",),
        ),
        cost_estimate=pl.CostEstimate(
            flops=flops,
            transcendentals=0,
            bytes_accessed=bytes_accessed,
        ),
    )(x, w1, b1, w2, b2, w3, b3)

    return out.reshape(-1)[:B].reshape(B, 1)


def init_params(key, input_dim):
    """Deterministic synthetic init matching nn.Linear shapes (PyTorch layout)."""
    k1, k2, k3, k4, k5, k6 = jax.random.split(key, 6)

    def lin(kw, kb, fan_in, fan_out):
        bound = 1.0 / jnp.sqrt(jnp.float32(fan_in))
        w = jax.random.uniform(kw, (fan_out, fan_in), jnp.float32, -bound, bound)
        b = jax.random.uniform(kb, (fan_out, 1), jnp.float32, -bound, bound)
        return w, b

    w1, b1 = lin(k1, k2, input_dim, 64)   # (64, D), (64, 1)
    w2, b2 = lin(k3, k4, 64, 32)          # (32, 64), (32, 1)
    w3, b3 = lin(k5, k6, 32, 1)           # (1, 32), (1, 1)
    return (w1, b1, w2, b2, w3.T, b3)     # store w3 as a (32, 1) column


def reference_forward(x, params):
    w1, b1, w2, b2, w3, b3 = params
    h1 = jnp.maximum(x @ w1.T + b1.T, 0.0)
    h2 = jnp.maximum(h1 @ w2.T + b2.T, 0.0)
    return h2 @ w3 + b3


if __name__ == "__main__":
    key = jax.random.PRNGKey(0)
    kx, kx2, kp = jax.random.split(key, 3)

    input_dim = 16
    params = init_params(kp, input_dim)

    # Small batch (clamped to a single 256-wide tile).
    B = 8
    x = jax.random.normal(kx, (B, input_dim), jnp.float32)
    out = jax.block_until_ready(income_regressor_forward(x, params))
    ref = reference_forward(x, params)
    assert out.shape == (B, 1)
    assert jnp.allclose(out, ref, atol=1e-4, rtol=1e-4)

    # Ragged batch spanning multiple grid blocks and inner chunks.
    B2 = 600
    x2 = jax.random.normal(kx2, (B2, input_dim), jnp.float32)
    out2 = jax.block_until_ready(income_regressor_forward(x2, params, block_b=512))
    ref2 = reference_forward(x2, params)
    assert out2.shape == (B2, 1)
    assert jnp.allclose(out2, ref2, atol=1e-4, rtol=1e-4)

    # bf16-input path (v6e/v7x roofline optimization); looser tolerance vs f32.
    out3 = jax.block_until_ready(
        income_regressor_forward(x2, params, use_bf16=True))
    assert out3.shape == (B2, 1)
    assert jnp.allclose(out3, ref2, atol=5e-2, rtol=5e-2)

    print("KERNEL_OK")
</pallas_src>

<mosaic_0001>
module attributes {stable_mosaic.version = 11 : i64} {
  func.func @mlp_kernel(%arg0: i32, %arg1: memref<256x16xf32, #tpu.memory_space<vmem>>, %arg2: memref<64x16xf32, #tpu.memory_space<vmem>>, %arg3: memref<64x1xf32, #tpu.memory_space<vmem>>, %arg4: memref<32x64xf32, #tpu.memory_space<vmem>>, %arg5: memref<32x1xf32, #tpu.memory_space<vmem>>, %arg6: memref<32x1xf32, #tpu.memory_space<vmem>>, %arg7: memref<1x1xf32, #tpu.memory_space<smem>>, %arg8: memref<1x256xf32, #tpu.memory_space<vmem>>) attributes {dimension_semantics = [#tpu.dimension_semantics<parallel>], iteration_bounds = array<i64: 1>, scalar_prefetch = 0 : i64, scratch_operands = 0 : i64, tpu.core_type = #tpu.core_type<tc>, window_params = [{transform_indices = @transform_0, window_bounds = array<i64: 256, 16>}, {pipeline_mode = #tpu.pipeline_mode<synchronous>, transform_indices = @transform_1, window_bounds = array<i64: 64, 16>}, {pipeline_mode = #tpu.pipeline_mode<synchronous>, transform_indices = @transform_2, window_bounds = array<i64: 64, 1>}, {pipeline_mode = #tpu.pipeline_mode<synchronous>, transform_indices = @transform_3, window_bounds = array<i64: 32, 64>}, {pipeline_mode = #tpu.pipeline_mode<synchronous>, transform_indices = @transform_4, window_bounds = array<i64: 32, 1>}, {pipeline_mode = #tpu.pipeline_mode<synchronous>, transform_indices = @transform_5, window_bounds = array<i64: 32, 1>}, {transform_indices = @transform_6, window_bounds = array<i64: 1, 1>}, {transform_indices = @transform_7, window_bounds = array<i64: 1, 256>}]} {
    %c0 = arith.constant 0 : index
    %c0_0 = arith.constant 0 : index
    %0 = vector.load %arg2[%c0, %c0_0] : memref<64x16xf32, #tpu.memory_space<vmem>>, vector<64x16xf32>
    %c0_1 = arith.constant 0 : index
    %c0_2 = arith.constant 0 : index
    %1 = vector.load %arg4[%c0_1, %c0_2] : memref<32x64xf32, #tpu.memory_space<vmem>>, vector<32x64xf32>
    %c0_3 = arith.constant 0 : index
    %c0_4 = arith.constant 0 : index
    %2 = vector.load %arg3[%c0_3, %c0_4] : memref<64x1xf32, #tpu.memory_space<vmem>>, vector<64x1xf32>
    %3 = vector.shape_cast %2 : vector<64x1xf32> to vector<64x1xf32>
    %4 = vector.broadcast %3 : vector<64x1xf32> to vector<64x256xf32>
    %c0_5 = arith.constant 0 : index
    %c0_6 = arith.constant 0 : index
    %5 = vector.load %arg5[%c0_5, %c0_6] : memref<32x1xf32, #tpu.memory_space<vmem>>, vector<32x1xf32>
    %6 = vector.shape_cast %5 : vector<32x1xf32> to vector<32x1xf32>
    %7 = vector.broadcast %6 : vector<32x1xf32> to vector<32x256xf32>
    %c0_7 = arith.constant 0 : index
    %c0_8 = arith.constant 0 : index
    %8 = vector.load %arg6[%c0_7, %c0_8] : memref<32x1xf32, #tpu.memory_space<vmem>>, vector<32x1xf32>
    %9 = vector.shape_cast %8 : vector<32x1xf32> to vector<32x1xf32>
    %10 = vector.broadcast %9 : vector<32x1xf32> to vector<32x256xf32>
    %c0_9 = arith.constant 0 : index
    %c0_10 = arith.constant 0 : index
    %11 = memref.load %arg7[%c0_9, %c0_10] : memref<1x1xf32, #tpu.memory_space<smem>>
    %c0_i32 = arith.constant 0 : i32
    %c256_i32 = arith.constant 256 : i32
    %12 = arith.muli %c0_i32, %c256_i32 : i32
    %13 = tpu.assume_multiple %12, 256 : i32
    %14 = arith.index_cast %13 : i32 to index
    %c0_11 = arith.constant 0 : index
    %15 = vector.load %arg1[%14, %c0_11] : memref<256x16xf32, #tpu.memory_space<vmem>>, vector<256x16xf32>
    %cst = arith.constant dense<0.000000e+00> : vector<64x256xf32>
    %16 = tpu.matmul %0, %15, %cst {dimension_numbers = #tpu.dot_dimension_numbers<[1], [1], [0], [0], [0, 0, 1, 0], [], []>} : vector<64x16xf32>, vector<256x16xf32>, vector<64x256xf32> -> vector<64x256xf32>
    %17 = arith.addf %16, %4 : vector<64x256xf32>
    %cst_12 = arith.constant 0.000000e+00 : f32
    %18 = vector.broadcast %cst_12 : f32 to vector<64x256xf32>
    %19 = arith.maximumf %17, %18 : vector<64x256xf32>
    %cst_13 = arith.constant dense<0.000000e+00> : vector<32x256xf32>
    %20 = tpu.matmul %1, %19, %cst_13 {dimension_numbers = #tpu.dot_dimension_numbers<[1], [0], [0], [1], [0, 0, 1, 1], [], []>} : vector<32x64xf32>, vector<64x256xf32>, vector<32x256xf32> -> vector<32x256xf32>
    %21 = arith.addf %20, %7 : vector<32x256xf32>
    %cst_14 = arith.constant 0.000000e+00 : f32
    %22 = vector.broadcast %cst_14 : f32 to vector<32x256xf32>
    %23 = arith.maximumf %21, %22 : vector<32x256xf32>
    %24 = arith.mulf %23, %10 : vector<32x256xf32>
    %cst_15 = arith.constant dense<0.000000e+00> : vector<256xf32>
    %25 = vector.multi_reduction <add>, %24, %cst_15 [0] : vector<32x256xf32> to vector<256xf32>
    %26 = vector.shape_cast %25 : vector<256xf32> to vector<1x256xf32>
    %27 = vector.broadcast %11 : f32 to vector<1x256xf32>
    %28 = arith.addf %26, %27 : vector<1x256xf32>
    %c0_16 = arith.constant 0 : index
    %29 = arith.index_cast %13 : i32 to index
    %30 = vector.load %arg8[%c0_16, %29] : memref<1x256xf32, #tpu.memory_space<vmem>>, vector<1x256xf32>
    tpu.vector_store %arg8[%c0_16, %29], %28 {strides = array<i32>} : memref<1x256xf32, #tpu.memory_space<vmem>>, vector<1x256xf32>,
    %c1_i32 = arith.constant 1 : i32
    return
  }
  func.func @transform_0(%arg0: i32) -> (i32, i32) {
    %c0_i32 = arith.constant 0 : i32
    %c0_i32_0 = arith.constant 0 : i32
    return %arg0, %c0_i32 : i32, i32
  }
  func.func @transform_1(%arg0: i32) -> (i32, i32) {
    %c0_i32 = arith.constant 0 : i32
    %c0_i32_0 = arith.constant 0 : i32
    %c0_i32_1 = arith.constant 0 : i32
    return %c0_i32, %c0_i32_0 : i32, i32
  }
  func.func @transform_2(%arg0: i32) -> (i32, i32) {
    %c0_i32 = arith.constant 0 : i32
    %c0_i32_0 = arith.constant 0 : i32
    %c0_i32_1 = arith.constant 0 : i32
    return %c0_i32, %c0_i32_0 : i32, i32
  }
  func.func @transform_3(%arg0: i32) -> (i32, i32) {
    %c0_i32 = arith.constant 0 : i32
    %c0_i32_0 = arith.constant 0 : i32
    %c0_i32_1 = arith.constant 0 : i32
    return %c0_i32, %c0_i32_0 : i32, i32
  }
  func.func @transform_4(%arg0: i32) -> (i32, i32) {
    %c0_i32 = arith.constant 0 : i32
    %c0_i32_0 = arith.constant 0 : i32
    %c0_i32_1 = arith.constant 0 : i32
    return %c0_i32, %c0_i32_0 : i32, i32
  }
  func.func @transform_5(%arg0: i32) -> (i32, i32) {
    %c0_i32 = arith.constant 0 : i32
    %c0_i32_0 = arith.constant 0 : i32
    %c0_i32_1 = arith.constant 0 : i32
    return %c0_i32, %c0_i32_0 : i32, i32
  }
  func.func @transform_6(%arg0: i32) -> (i32, i32) {
    %c0_i32 = arith.constant 0 : i32
    %c0_i32_0 = arith.constant 0 : i32
    %c0_i32_1 = arith.constant 0 : i32
    return %c0_i32, %c0_i32_0 : i32, i32
  }
  func.func @transform_7(%arg0: i32) -> (i32, i32) {
    %c0_i32 = arith.constant 0 : i32
    %c0_i32_0 = arith.constant 0 : i32
    return %c0_i32, %arg0 : i32, i32
  }
}

</mosaic_0001>

<bundles_post_ra>
// kernel: tpu_custom_call.1
= control target key start
LH: loop header
LB: loop body
LE: loop exit
PB: predicated region body
PF: predicated region fallthrough
CT: control target
= control target key end

     0   :  { %vm169_vm0 = vcmask 130048   ;;  %v715_v3 = vmov 0   ;;  %s1001_s0 = inlined_call_operand.vmem [shape: f32[256,16], index: 0, kind: input, shape index: {}]   ;;  %s1002_s1 = inlined_call_operand.vmem [shape: f32[64,16], index: 1, kind: input, shape index: {}]   ;;  %s1003_s2 = inlined_call_operand.vmem [shape: f32[64,1], index: 2, kind: input, shape index: {}]   ;;  %s1004_s3 = inlined_call_operand.vmem [shape: f32[32,64], index: 3, kind: input, shape index: {}]   ;;  %s1005_s4 = inlined_call_operand.vmem [shape: f32[32,1], index: 4, kind: input, shape index: {}]   ;;  %s1006_s5 = inlined_call_operand.vmem [shape: f32[32,1], index: 5, kind: input, shape index: {}]   ;;  %s1007_s6 = inlined_call_operand.<no memory space> [shape: f32[1,1], index: 6, kind: input, shape index: {}]   ;;  %s1008_s7 = inlined_call_operand.hbm [shape: f32[1,256], index: 7, kind: output, shape index: {}]  }
   0x1   :  { %v168_v0 = vld [vmem:[%s1001_s0 + $0xf8] sm:$0xff]  ;;  %v167_v2 = vld [vmem:[%s1001_s0 + $0xf0] sm:$0xff]  ;;  %692 = vset.pattern.permute.xlu1 %v715_v3  ;;  %691 = vset.pattern.permute.xlu0 %v715_v3  ;;  %v166_v5 = vld [vmem:[%s1001_s0 + $0xe8] sm:$0xff] }
   0x2   :  { %v152_v1 = vld [vmem:[%s1001_s0 + $0x78] sm:$0xff]  ;;  %639 = vmatprep.subr.msk.mxu0 %vm169_vm0, %v168_v0  ;;  %v151_v4 = vld [vmem:[%s1001_s0 + $0x70] sm:$0xff]  ;;  %v150_v6 = vld [vmem:[%s1001_s0 + $0x68] sm:$0xff] }
   0x3   :  { %640 = vmatpush3.xpose.msk.msra.mxu0 %vm169_vm0, %v152_v1  ;;  %v165_v7 = vld [vmem:[%s1001_s0 + $0xe0] sm:$0xff]  ;;  %v164_v10 = vld [vmem:[%s1001_s0 + $0xd8] sm:$0xff]  ;;  %v45_v11 = vld [vmem:[%s1003_s2 + $0x28] sm:$0xff] }
   0x4   :  { %641 = vmatprep.subr.msk.mxu0 %vm169_vm0, %v167_v2  ;;  %v789_v8 = vld [vmem:[%s1002_s1] sm:$0xff]  ;;  %v47_v12 = vld [vmem:[%s1003_s2 + $0x38] sm:$0xff]  ;;  %75 = vperm.xlu1 %692, %v45_v11   ;;  %v163_v15 = vld [vmem:[%s1001_s0 + $0xd0] sm:$0xff] }
   0x5   :  { %v149_v9 = vld [vmem:[%s1001_s0 + $0x60] sm:$0xff]  ;;  %671 = vmatprep.mubr.msk.f32.mxu0 %vm169_vm0, %v789_v8  ;;  %v148_v13 = vld [vmem:[%s1001_s0 + $0x58] sm:$0xff]  ;;  %85 = vperm.xlu0 %691, %v47_v12   ;;  %v46_v16 = vld [vmem:[%s1003_s2 + $0x30] sm:$0xff] }
   0x6   :  { %v44_v14 = vld [vmem:[%s1003_s2 + $0x20] sm:$0xff] }
   0x7   :  { %642 = vmatpush3.xpose.msk.msra.mxu0 %vm169_vm0, %v151_v4 }
   0x8   :  { %643 = vmatprep.subr.msk.mxu0 %vm169_vm0, %v166_v5  ;;  %70 = vperm.xlu1 %692, %v44_v14  }
   0xb   :  { %644 = vmatpush3.xpose.msk.msra.mxu0 %vm169_vm0, %v150_v6 }
   0xc   :  { %645 = vmatprep.subr.msk.mxu0 %vm169_vm0, %v165_v7 }
   0xf   :  { %646 = vmatpush3.xpose.msk.msra.mxu0 %vm169_vm0, %v149_v9 }
  0x10   :  { %647 = vmatprep.subr.msk.mxu0 %vm169_vm0, %v164_v10 }
  0x13   :  { %648 = vmatpush3.xpose.msk.msra.mxu0 %vm169_vm0, %v148_v13 }
  0x14   :  { %13 = vsyncpa [#allocation4], 0  ;;  %649 = vmatprep.subr.msk.mxu0 %vm169_vm0, %v163_v15  ;;  %v147_v17 = vld [vmem:[%s1001_s0 + $0x50] sm:$0xff]  ;;  %80 = vperm.xlu0 %691, %v46_v16   ;;  %v162_v19 = vld [vmem:[%s1001_s0 + $0xc8] sm:$0xff]  ;;  %v716_v57 = vmov 0.0   ;;  %vm419_vm1 = vcmask 523264  }
  0x15   :  { %v42_v18 = vld [vmem:[%s1003_s2 + $0x10] sm:$0xff]  ;;  %v43_v20 = vld [vmem:[%s1003_s2 + $0x18] sm:$0xff]  ;;  %v146_v21 = vld [vmem:[%s1001_s0 + $0x48] sm:$0xff]  ;;  %496 = vmatprep.mubr.f32.mxu1 %v716_v57  ;;  %s718_s21 = smov [#allocation3]  }
  0x16   :  { %60 = vperm.xlu1 %692, %v42_v18   ;;  %v40_v22 = vld [vmem:[%s1003_s2] sm:$0xff]  ;;  %v41_v24 = vld [vmem:[%s1003_s2 + $0x8] sm:$0xff]  ;;  %v160_v27 = vld [vmem:[%s1001_s0 + $0xb8] sm:$0xff]  ;;  %s587_s22 = sshll.u32 %s718_s21, 4  ;;  %s588_s22 = int_to_ptr.vmem [resolvable:$true] %s587_s22 }
  0x17   :  { %650 = vmatpush3.xpose.msk.msra.mxu0 %vm169_vm0, %v147_v17  ;;  %v161_v23 = vld [vmem:[%s1001_s0 + $0xc0] sm:$0xff]  ;;  %v89_v26 = vld [vmem:[%s1005_s4 + $0x8] sm:$0xff]  ;;  %v144_v29 = vld [vmem:[%s1001_s0 + $0x38] sm:$0xff]  ;;  %s693_s23 = scalar_lea.vmem %s588_s22, 32  ;;  %p698_p1 = scmp.lt.s32.totalorder %s588_s22, %s588_s22 }
  0x18   :  { %651 = vmatprep.subr.msk.mxu0 %vm169_vm0, %v162_v19  ;;  %65 = vperm.xlu0 %691, %v43_v20   ;;  %v145_v25 = vld [vmem:[%s1001_s0 + $0x40] sm:$0xff]  ;;  %v91_v30 = vld [vmem:[%s1005_s4 + $0x18] sm:$0xff]  ;;  %v159_v31 = vld [vmem:[%s1001_s0 + $0xb0] sm:$0xff]  ;;  %p694_p0 = scmp.ne.s32.totalorder %s588_s22, %s693_s23  ;;  %p699_p2 = scmp.lt.s32.totalorder %s693_s23, %s693_s23 }
  0x19   :  { %v88_v28 = vld [vmem:[%s1005_s4] sm:$0xff]  ;;  %v90_v32 = vld [vmem:[%s1005_s4 + $0x10] sm:$0xff]  ;;  %v113_v34 = vld [vmem:[%s1006_s5 + $0x8] sm:$0xff] }
  0x1a   :  { %50 = vperm.xlu1 %692, %v40_v22   ;;  %v143_v33 = vld [vmem:[%s1001_s0 + $0x30] sm:$0xff]  ;;  %v158_v35 = vld [vmem:[%s1001_s0 + $0xa8] sm:$0xff]  ;;  %v112_v36 = vld [vmem:[%s1006_s5] sm:$0xff]  ;;  %p700_p3 = por %p699_p2, %p698_p1 }
  0x1b   :  { %652 = vmatpush3.xpose.msk.msra.mxu0 %vm169_vm0, %v146_v21  ;;  %v142_v37 = vld [vmem:[%s1001_s0 + $0x28] sm:$0xff]  ;;  %v115_v38 = vld [vmem:[%s1006_s5 + $0x18] sm:$0xff]  ;;  %v157_v39 = vld [vmem:[%s1001_s0 + $0xa0] sm:$0xff] }
  0x1c   :  { %653 = vmatprep.subr.msk.mxu0 %vm169_vm0, %v161_v23  ;;  %55 = vperm.xlu0 %691, %v41_v24   ;;  %v114_v40 = vld [vmem:[%s1006_s5 + $0x10] sm:$0xff]  ;;  %v141_v41 = vld [vmem:[%s1001_s0 + $0x20] sm:$0xff]  ;;  %v156_v42 = vld [vmem:[%s1001_s0 + $0x98] sm:$0xff]  ;;  %p701_p4 = pnand %p700_p3, %p694_p0 }
  0x1d   :  { %v140_v43 = vld [vmem:[%s1001_s0 + $0x18] sm:$0xff]  ;;  %v155_v44 = vld [vmem:[%s1001_s0 + $0x90] sm:$0xff]  ;;  %v154_v46 = vld [vmem:[%s1001_s0 + $0x88] sm:$0xff] }
  0x1e   :  { %99 = vperm.xlu1 %692, %v89_v26   ;;  %v139_v45 = vld [vmem:[%s1001_s0 + $0x10] sm:$0xff]  ;;  %v138_v47 = vld [vmem:[%s1001_s0 + $0x8] sm:$0xff]  ;;  %v153_v48 = vld [vmem:[%s1001_s0 + $0x80] sm:$0xff] }
  0x1f   :  { %654 = vmatpush3.xpose.msk.msra.mxu0 %vm169_vm0, %v145_v25  ;;  %v137_v49 = vld [vmem:[%s1001_s0] sm:$0xff]  ;;  %v29_v50 = vld [vmem:[%s1002_s1 + $0x8] sm:$0xff]  ;;  %v30_v51 = vld [vmem:[%s1002_s1 + $0x10] sm:$0xff] }
  0x20   :  { %655 = vmatprep.subr.msk.mxu0 %vm169_vm0, %v160_v27  ;;  %94 = vperm.xlu0 %691, %v88_v28   ;;  %v31_v52 = vld [vmem:[%s1002_s1 + $0x18] sm:$0xff]  ;;  %v32_v53 = vld [vmem:[%s1002_s1 + $0x20] sm:$0xff]  ;;  %v33_v54 = vld [vmem:[%s1002_s1 + $0x28] sm:$0xff] }
  0x21   :  { %v34_v55 = vld [vmem:[%s1002_s1 + $0x30] sm:$0xff]  ;;  %v35_v56 = vld [vmem:[%s1002_s1 + $0x38] sm:$0xff] }
  0x22   :  { %109 = vperm.xlu1 %692, %v91_v30  }
  0x23   :  { %656 = vmatpush3.xpose.msk.msra.mxu0 %vm169_vm0, %v144_v29 }
  0x24   :  { %657 = vmatprep.subr.msk.mxu0 %vm169_vm0, %v159_v31  ;;  %104 = vperm.xlu0 %691, %v90_v32  }
  0x26   :  { %123 = vperm.xlu1 %692, %v113_v34  }
  0x27   :  { %658 = vmatpush3.xpose.msk.msra.mxu0 %vm169_vm0, %v143_v33 }
  0x28   :  { %659 = vmatprep.subr.msk.mxu0 %vm169_vm0, %v158_v35  ;;  %118 = vperm.xlu0 %691, %v112_v36  }
  0x2a   :  { %133 = vperm.xlu1 %692, %v115_v38  }
  0x2b   :  { %660 = vmatpush3.xpose.msk.msra.mxu0 %vm169_vm0, %v142_v37 }
  0x2c   :  { %661 = vmatprep.subr.msk.mxu0 %vm169_vm0, %v157_v39  ;;  %128 = vperm.xlu0 %691, %v114_v40  }
  0x2f   :  { %662 = vmatpush3.xpose.msk.msra.mxu0 %vm169_vm0, %v141_v41 }
  0x30   :  { %663 = vmatprep.subr.msk.mxu0 %vm169_vm0, %v156_v42 }
  0x33   :  { %664 = vmatpush3.xpose.msk.msra.mxu0 %vm169_vm0, %v140_v43 }
  0x34   :  { %665 = vmatprep.subr.msk.mxu0 %vm169_vm0, %v155_v44 }
  0x37   :  { %666 = vmatpush3.xpose.msk.msra.mxu0 %vm169_vm0, %v139_v45 }
  0x38   :  { %667 = vmatprep.subr.msk.mxu0 %vm169_vm0, %v154_v46 }
  0x3b   :  { %668 = vmatpush3.xpose.msk.msra.mxu0 %vm169_vm0, %v138_v47 }
  0x3c   :  { %669 = vmatprep.subr.msk.mxu0 %vm169_vm0, %v153_v48 }
  0x3f   :  { %670 = vmatpush3.xpose.msk.msra.mxu0 %vm169_vm0, %v137_v49 }
  0x42   :  { %672 = vmatmul.mubr.msk.f32.vlgmr.msra.gmra.mxu0 %vm169_vm0, %v789_v8 }
  0x43   :  { %673 = vmatprep.mubr.msk.f32.mxu0 %vm169_vm0, %v29_v50 }
  0x46   :  { %674 = vmatmul.mubr.msk.f32.gmra.mxu0 %vm169_vm0, %v29_v50  ;;  %v36_v50 = vld [vmem:[%s1004_s3] sm:$0xff] }
  0x47   :  { %675 = vmatprep.mubr.msk.f32.mxu0 %vm169_vm0, %v30_v51 }
  0x4a   :  { %676 = vmatmul.mubr.msk.f32.gmra.mxu0 %vm169_vm0, %v30_v51  ;;  %v37_v51 = vld [vmem:[%s1004_s3 + $0x8] sm:$0xff] }
  0x4b   :  { %677 = vmatprep.mubr.msk.f32.mxu0 %vm169_vm0, %v31_v52 }
  0x4e   :  { %678 = vmatmul.mubr.msk.f32.gmra.mxu0 %vm169_vm0, %v31_v52  ;;  %v38_v52 = vld [vmem:[%s1004_s3 + $0x10] sm:$0xff] }
  0x4f   :  { %679 = vmatprep.mubr.msk.f32.mxu0 %vm169_vm0, %v32_v53 }
  0x52   :  { %680 = vmatmul.mubr.msk.f32.gmra.mxu0 %vm169_vm0, %v32_v53  ;;  %v39_v53 = vld [vmem:[%s1004_s3 + $0x18] sm:$0xff] }
  0x53   :  { %681 = vmatprep.mubr.msk.f32.mxu0 %vm169_vm0, %v33_v54 }
  0x56   :  { %682 = vmatmul.mubr.msk.f32.gmra.mxu0 %vm169_vm0, %v33_v54 }
  0x57   :  { %683 = vmatprep.mubr.msk.f32.mxu0 %vm169_vm0, %v34_v55 }
  0x5a   :  { %684 = vmatmul.mubr.msk.f32.gmra.mxu0 %vm169_vm0, %v34_v55 }
  0x5b   :  { %685 = vmatprep.mubr.msk.f32.mxu0 %vm169_vm0, %v35_v56 }
  0x5e   :  { %686 = vmatmul.mubr.msk.f32.gmra.mxu0 %vm169_vm0, %v35_v56 }
  0x7f   :  { %v76_v7 = vpop.permute.xlu1 %75 }
  0x80   :  { %v86_v5 = vpop.permute.xlu0 %85 }
  0x83   :  { %v71_v12 = vpop.permute.xlu1 %70 }
  0x8f   :  { %v81_v10 = vpop.permute.xlu0 %80 }
  0x91   :  { %v61_v23 = vpop.permute.xlu1 %60 }
  0x93   :  { %v66_v18 = vpop.permute.xlu0 %65 }
  0x95   :  { %v51_v37 = vpop.permute.xlu1 %50 }
  0x97   :  { %v56_v32 = vpop.permute.xlu0 %55 }
  0x99   :  { %v100_v55 = vpop.permute.xlu1 %99 }
  0x9b   :  { %v95_v54 = vpop.permute.xlu0 %94 }
  0x9f   :  { %v105_v56 = vpop.permute.xlu0 %104 }
 0x102   :  { %v356_v58 = vpop.f32.mrf.mxu0 }
 0x103   :  { %v357_v44 = vadd.f32 %v356_v58, %v51_v37 }
 0x104   :  { %v358_v59 = vpop.f32.mrf.mxu0 }
 0x105   :  { %v359_v42 = vadd.f32 %v358_v59, %v51_v37  ;;  %v403_v49 = vmax.f32 %v357_v44, 0.0 }
 0x106   :  { %v362_v60 = vpop.f32.mrf.mxu0 }
 0x107   :  { %v363_v40 = vadd.f32 %v362_v60, %v56_v32  ;;  %v404_v48 = vmax.f32 %v359_v42, 0.0  ;;  %v110_v60 = vpop.permute.xlu1 %109 }
 0x108   :  { %v364_v61 = vpop.f32.mrf.mxu0 }
 0x109   :  { %v365_v38 = vadd.f32 %v364_v61, %v56_v32  ;;  %v405_v47 = vmax.f32 %v363_v40, 0.0 }
 0x10a   :  { %v368_v62 = vpop.f32.mrf.mxu0 }
 0x10b   :  { %v369_v35 = vadd.f32 %v368_v62, %v61_v23  ;;  %v406_v46 = vmax.f32 %v365_v38, 0.0 }
 0x10c   :  { %v370_v63 = vpop.f32.mrf.mxu0 }
 0x10d   :  { %v371_v33 = vadd.f32 %v370_v63, %v61_v23  ;;  %v407_v45 = vmax.f32 %v369_v35, 0.0 }
 0x10e   :  { %v374_v0 = vpop.f32.mrf.mxu0 }
 0x10f   :  { %v375_v30 = vadd.f32 %v374_v0, %v66_v18  ;;  %v408_v43 = vmax.f32 %v371_v33, 0.0  ;;  %v119_v0 = vpop.permute.xlu0 %118 }
 0x110   :  { %v376_v1 = vpop.f32.mrf.mxu0 }
 0x111   :  { %v377_v28 = vadd.f32 %v376_v1, %v66_v18  ;;  %v409_v41 = vmax.f32 %v375_v30, 0.0 }
 0x112   :  { %v380_v2 = vpop.f32.mrf.mxu0 }
 0x113   :  { %v381_v26 = vadd.f32 %v380_v2, %v71_v12  ;;  %v410_v39 = vmax.f32 %v377_v28, 0.0 }
 0x114   :  { %v382_v3 = vpop.f32.mrf.mxu0 }
 0x115   :  { %v383_v24 = vadd.f32 %v382_v3, %v71_v12  ;;  %v411_v36 = vmax.f32 %v381_v26, 0.0 }
 0x116   :  { %v386_v4 = vpop.f32.mrf.mxu0 }
 0x117   :  { %v387_v21 = vadd.f32 %v386_v4, %v76_v7  ;;  %v412_v34 = vmax.f32 %v383_v24, 0.0 }
 0x118   :  { %v388_v6 = vpop.f32.mrf.mxu0 }
 0x119   :  { %v389_v19 = vadd.f32 %v388_v6, %v76_v7  ;;  %v413_v31 = vmax.f32 %v387_v21, 0.0 }
 0x11a   :  { %v392_v8 = vpop.f32.mrf.mxu0 }
 0x11b   :  { %v393_v17 = vadd.f32 %v392_v8, %v81_v10  ;;  %v414_v29 = vmax.f32 %v389_v19, 0.0  ;;  %v124_v8 = vpop.permute.xlu1 %123 }
 0x11c   :  { %v394_v9 = vpop.f32.mrf.mxu0 }
 0x11d   :  { %v395_v15 = vadd.f32 %v394_v9, %v81_v10  ;;  %v415_v27 = vmax.f32 %v393_v17, 0.0 }
 0x11e   :  { %v398_v11 = vpop.f32.mrf.mxu0 }
 0x11f   :  { %v399_v13 = vadd.f32 %v398_v11, %v86_v5  ;;  %v416_v25 = vmax.f32 %v395_v15, 0.0 }
 0x120   :  { %v400_v14 = vpop.f32.mrf.mxu0 }
 0x121   :  { %v401_v16 = vadd.f32 %v400_v14, %v86_v5  ;;  %v417_v22 = vmax.f32 %v399_v13, 0.0  ;;  %v129_v14 = vpop.permute.xlu0 %128 }
 0x123   :  { %v418_v20 = vmax.f32 %v401_v16, 0.0 }
 0x125   :  { %448 = vmatprep.subr.mxu1 %v418_v20 }
 0x126   :  { %449 = vmatpush1.msra.mxu1 %v417_v22 }
 0x127   :  { %450 = vmatprep.subr.mxu1 %v416_v25 }
 0x128   :  { %451 = vmatpush1.msra.mxu1 %v415_v27  ;;  %v134_v27 = vpop.permute.xlu1 %133 }
 0x129   :  { %452 = vmatprep.subr.mxu1 %v414_v29 }
 0x12a   :  { %453 = vmatpush1.msra.mxu1 %v413_v31 }
 0x12b   :  { %454 = vmatprep.subr.mxu1 %v412_v34 }
 0x12c   :  { %455 = vmatpush1.msra.mxu1 %v411_v36 }
 0x12d   :  { %456 = vmatprep.subr.mxu1 %v410_v39 }
 0x12e   :  { %457 = vmatpush1.msra.mxu1 %v409_v41 }
 0x12f   :  { %458 = vmatprep.subr.mxu1 %v408_v43  ;;  %v717_v43 = vmov 1966171168  }
 0x130   :  { %459 = vmatpush1.msra.mxu1 %v407_v45  ;;  %v562_v44 = vunpack.c.l.s4 %v717_v43  ;;  %v564_v45 = vlaneseq }
 0x131   :  { %460 = vmatprep.subr.mxu1 %v406_v46 }
 0x132   :  { %461 = vmatpush1.msra.mxu1 %v405_v47  ;;  %vm578_vm2 = vcmp.lt.s32.totalorder %v564_v45, 256 }
 0x133   :  { %462 = vmatprep.subr.mxu1 %v404_v48 }
 0x134   :  { %463 = vmatpush1.msra.mxu1 %v403_v49 }
 0x135   :  { %635 = vmatmul.mubr.msk.f32.vlgmr.msra.gmra.mxu1 %vm419_vm1, %v36_v50  ;;  %v563_v50 = vunpack.c.0.s8 %v562_v44 }
 0x136   :  { %502 = vmatprep.mubr.f32.mxu1 %v716_v57 }
 0x139   :  { %636 = vmatmul.mubr.msk.f32.gmra.mxu1 %vm419_vm1, %v37_v51  ;;  %v565_v51 = vshrl.u32 %v564_v45, 7 }
 0x13a   :  { %508 = vmatprep.mubr.f32.mxu1 %v716_v57 }
 0x13d   :  { %637 = vmatmul.mubr.msk.f32.gmra.mxu1 %vm419_vm1, %v38_v52  ;;  %v555_v52 = vstv %s1007_s6 }
 0x13e   :  { %514 = vmatprep.mubr.f32.mxu1 %v716_v57 }
 0x141   :  { %638 = vmatmul.mubr.msk.f32.gmra.mxu1 %vm419_vm1, %v39_v53 }
 0x1f5   :  { %v498_v58 = vpop.f32.mrf.mxu1 }
 0x1f6   :  { %v499_v61 = vadd.f32 %v498_v58, %v95_v54 }
 0x1f7   :  { %v500_v59 = vpop.f32.mrf.mxu1 }
 0x1f8   :  { %v501_v1 = vadd.f32 %v500_v59, %v95_v54  ;;  %v521_v57 = vmax.f32 %v499_v61, 0.0 }
 0x1f9   :  { %v504_v62 = vpop.f32.mrf.mxu1 }
 0x1fa   :  { %v505_v63 = vadd.f32 %v504_v62, %v100_v55  ;;  %v522_v9 = vmax.f32 %v501_v1, 0.0  ;;  %v529_v15 = vmul.f32 %v521_v57, %v119_v0 }
 0x1fb   :  { %v506_v2 = vpop.f32.mrf.mxu1 }
 0x1fc   :  { %v523_v3 = vmax.f32 %v505_v63, 0.0  ;;  %v507_v4 = vadd.f32 %v506_v2, %v100_v55  ;;  %v530_v21 = vmul.f32 %v522_v9, %v119_v0 }
 0x1fd   :  { %v510_v5 = vpop.f32.mrf.mxu1 }
 0x1fe   :  { %v524_v6 = vmax.f32 %v507_v4, 0.0  ;;  %v511_v7 = vadd.f32 %v510_v5, %v105_v56  ;;  %v531_v11 = vmul.f32 %v523_v3, %v124_v8 }
 0x1ff   :  { %v512_v10 = vpop.f32.mrf.mxu1 }
 0x200   :  { %v525_v12 = vmax.f32 %v511_v7, 0.0  ;;  %v513_v13 = vadd.f32 %v512_v10, %v105_v56  ;;  %v532_v17 = vmul.f32 %v524_v6, %v124_v8  ;;  %v537_v23 = vadd.f32 %v531_v11, %v529_v15 }
 0x201   :  { %v516_v16 = vpop.f32.mrf.mxu1  ;;  %v566_v56 = vsub.s32 %v563_v50, %v565_v51 }
 0x202   :  { %v533_v18 = vmul.f32 %v525_v12, %v129_v14  ;;  %v526_v19 = vmax.f32 %v513_v13, 0.0  ;;  %v517_v20 = vadd.f32 %v516_v16, %v110_v60  ;;  %v546_v28 = vadd.f32 %v532_v17, %v530_v21 }
 0x203   :  { %v518_v22 = vpop.f32.mrf.mxu1 }
 0x204   :  { %v534_v24 = vmul.f32 %v526_v19, %v129_v14  ;;  %v527_v25 = vmax.f32 %v517_v20, 0.0  ;;  %v519_v26 = vadd.f32 %v518_v22, %v110_v60  ;;  %v538_v29 = vadd.f32 %v537_v23, %v533_v18 }
 0x206   :  { %v535_v30 = vmul.f32 %v527_v25, %v134_v27  ;;  %v528_v31 = vmax.f32 %v519_v26, 0.0  ;;  %v547_v32 = vadd.f32 %v546_v28, %v534_v24 }
 0x208   :  { %v539_v33 = vadd.f32 %v538_v29, %v535_v30  ;;  %v536_v34 = vmul.f32 %v528_v31, %v134_v27 }
 0x20a   :  { %v540_v35 = vrot.slane %v539_v33, 4  ;;  %v548_v36 = vadd.f32 %v547_v32, %v536_v34 }
 0x20c   :  { %v541_v37 = vadd.f32 %v540_v35, %v539_v33  ;;  %v549_v38 = vrot.slane %v548_v36, 4 }
 0x20e   :  { %v542_v39 = vrot.slane %v541_v37, 2  ;;  %v550_v40 = vadd.f32 %v549_v38, %v548_v36 }
 0x210   :  { %v543_v41 = vadd.f32 %v542_v39, %v541_v37  ;;  %v551_v42 = vrot.slane %v550_v40, 2 }
 0x212   :  { %v544_v46 = vrot.slane %v543_v41, 1  ;;  %v552_v47 = vadd.f32 %v551_v42, %v550_v40 }
 0x214   :  { %v545_v48 = vadd.f32 %v544_v46, %v543_v41  ;;  %v553_v49 = vrot.slane %v552_v47, 1 }
 0x216   :  { %v554_v53 = vadd.f32 %v553_v49, %v552_v47  ;;  %v556_v54 = vadd.f32 %v555_v52, %v545_v48 }
 0x218   :  { %v557_v55 = vadd.f32 %v555_v52, %v554_v53 }
 0x21a   :  { %v560_v58 = vcombine.low %v556_v54, %v557_v55 }
 0x21c   :  { %v567_v59 = vrot.slane %v560_v58, %v566_v56 }
 0x21e   :  { %v574_v60 = vrot.slane %v567_v59, %v566_v56 }
 0x220   :  { %580 = vst.msk [vmem:[#allocation3] sm:$0x3] %vm578_vm2, %v574_v60 }
 0x221   :  { %704 = shalt.err (!%p701_p4)
}
 0x222   :  { %590 = dma.vmem_to_hbm [thread:$0]  %s588_s22, 32, %s1008_s7, [#allocation4]  }
 0x223   :  { %713 = dma.done.wait [#allocation4], 32  }
 0x224   :  { %714 = vsyncadd [#allocation4], 4294967264 }
 0x225   :  { %594 = vsyncpa [#allocation4], 1 }

</bundles_post_ra>
